<compile_context>
chip_gen: v6e
topology: v6e:2x2x1
jax: 0.10.0
libtpu: 0.0.40
codegen_flags: <defaults>
</compile_context>

<pallas_src>
import functools

import jax
import jax.numpy as jnp
from jax import lax
from jax.experimental import pallas as pl
from jax.experimental.pallas import tpu as pltpu

MIN_NORM = 1e-15
MIN_SQNORM = 1e-30           # MIN_NORM ** 2
EPS_F32 = 4e-3               # PoincareBall.eps[torch.float32]
ARTANH_CLAMP = 1e-15         # HGCN Artanh clamps its argument to (-1+1e-15, 1-1e-15)


def _round_up(a, b):
    return ((a + b - 1) // b) * b


def _artanh(z):
    # 0.5*(log(1+z) - log(1-z)): both logs go to the EUP, no VALU divide.
    z = jnp.clip(z, -1.0 + ARTANH_CLAMP, 1.0 - ARTANH_CLAMP)
    return 0.5 * (jnp.log(1.0 + z) - jnp.log(1.0 - z))


def _inv_norm_and_norm(sumsq):
    """(1/||v||, ||v||) with ||v|| clamped at MIN_NORM, via EUP rsqrt."""
    s = jnp.maximum(sumsq, MIN_SQNORM)
    inv = lax.rsqrt(s)
    return inv, s * inv


def _hnn_layer_kernel(x_ref, wt_ref, hbr_ref, hbc_ref, hbss_ref, o_ref, *, c):
    c = float(c)
    sqrt_c = c ** 0.5
    inv_sqrt_c = 1.0 / sqrt_c
    maxnorm = (1.0 - EPS_F32) / sqrt_c
    inv_maxnorm = sqrt_c / (1.0 - EPS_F32)

    x_raw = x_ref[...]                            # (tile_n, d_in), input dtype
    xf = x_raw.astype(jnp.float32)
    hb_row = hbr_ref[...].astype(jnp.float32)     # (1, d_out)   proj(expmap0(bias))
    hb_col = hbc_ref[...].astype(jnp.float32)     # (d_out, 1)   its transpose
    y2 = hbss_ref[...].astype(jnp.float32)        # (1, 1)       ||hyp_bias||^2

    # ---------------- HypLinear: mobius_matvec(W, x, c) then proj -----------
    x_sumsq = jnp.sum(xf * xf, axis=-1, keepdims=True)
    inv_x_norm, x_norm = _inv_norm_and_norm(x_sumsq)

    # bf16 operands -> native MXU rate; accumulation in f32.
    mx = jnp.dot(x_raw.astype(wt_ref.dtype), wt_ref[...],
                 preferred_element_type=jnp.float32)           # (tile_n, d_out)
    mx_sumsq = jnp.sum(mx * mx, axis=-1, keepdims=True)
    inv_mx_norm, mx_norm = _inv_norm_and_norm(mx_sumsq)

    t = jnp.tanh(mx_norm * inv_x_norm * _artanh(sqrt_c * x_norm))   # >= 0
    zero_row = mx_sumsq == 0.0                    # torch: all(mx == 0, dim=-1)
    mv_scale = jnp.where(zero_row, 0.0, t * inv_mx_norm * inv_sqrt_c)
    # Analytic ||mv|| assumes mx_norm*inv_mx_norm == 1; that only breaks for
    # denormal-scale rows (0 < mx_sumsq < MIN_SQNORM) where mv ~ 1e-15 and any
    # divergence from the reference is far below tolerance.
    mv_norm = jnp.maximum(jnp.where(zero_row, 0.0, t * inv_sqrt_c), MIN_NORM)
    clip_mv = mv_norm > maxnorm
    s1 = mv_scale * jnp.where(clip_mv, maxnorm / mv_norm, 1.0)  # res = mx * s1
    res_norm = jnp.where(clip_mv, maxnorm, mv_norm)
    x2 = res_norm * res_norm                                    # ||res||^2

    # ---------------- HypLinear: proj(mobius_add(res, hyp_b, c)) ------------
    # <res, hyp_b> = s1 * (mx @ hyp_b^T): MXU matvec instead of an XLU reduce;
    # `res` itself is never materialized.
    xy = s1 * jnp.dot(mx, hb_col, preferred_element_type=jnp.float32)
    two_c_xy = (2.0 * c) * xy
    den = jnp.maximum(1.0 + two_c_xy + (c * c) * x2 * y2, MIN_NORM)
    inv_den = 1.0 / den
    coef_r = (1.0 + two_c_xy + c * y2) * inv_den                # (tile_n, 1)
    coef_b = (1.0 - c * x2) * inv_den                           # (tile_n, 1)
    h = mx * (s1 * coef_r) + hb_row * coef_b                    # (tile_n, d_out)

    # ||h||^2 analytically from per-row scalars (no full-tile reduce).
    h_sumsq = (coef_r * coef_r) * x2 + 2.0 * (coef_r * coef_b) * xy \
        + (coef_b * coef_b) * y2
    inv_h_norm, h_norm = _inv_norm_and_norm(h_sumsq)
    clip_h = h_norm > maxnorm
    proj_h = jnp.where(clip_h, maxnorm * inv_h_norm, 1.0)
    hp_norm = jnp.where(clip_h, maxnorm, h_norm)                # ||proj(h)||
    inv_hp_norm = jnp.where(clip_h, inv_maxnorm, inv_h_norm)

    # ---------------- HypAct: relu(logmap0) -> expmap0 -> proj --------------
    # logmap0(proj(h)) = s2 * h with s2 >= 0, so relu(s2*h) = s2*relu(h); s2
    # folds into the tanh argument and the final per-row multiplier, and `xt`
    # is never materialized.
    s2 = proj_h * _artanh(sqrt_c * hp_norm) * inv_sqrt_c * inv_hp_norm
    r = jnp.maximum(h, 0.0)
    r_sumsq = jnp.sum(r * r, axis=-1, keepdims=True)
    inv_r_norm, r_norm = _inv_norm_and_norm(r_sumsq)
    tanh_u = jnp.tanh(sqrt_c * (s2 * r_norm))                   # ||xt|| = s2*||r||
    g_norm = jnp.maximum(tanh_u * inv_sqrt_c, MIN_NORM)         # ||expmap0|| analytic
    # Exact reciprocal: this factor scales stored outputs on clipped rows.
    proj_f = jnp.where(g_norm > maxnorm, maxnorm / g_norm, 1.0)
    out = r * (tanh_u * inv_r_norm * inv_sqrt_c * proj_f)

    o_ref[...] = out.astype(o_ref.dtype)


def _poincare_bias(bias, c):
    """proj(expmap0(proj_tan0(bias))) on the Poincare ball, as a (1, d) row."""
    c = jnp.float32(c)
    sqrt_c = jnp.sqrt(c)
    maxnorm = (1.0 - EPS_F32) / sqrt_c
    b = bias.astype(jnp.float32).reshape(1, -1)
    bn = jnp.maximum(jnp.linalg.norm(b, axis=-1, keepdims=True), MIN_NORM)
    eb = jnp.tanh(sqrt_c * bn) * b / (sqrt_c * bn)              # expmap0
    en = jnp.maximum(jnp.linalg.norm(eb, axis=-1, keepdims=True), MIN_NORM)
    return jnp.where(en > maxnorm, eb / en * maxnorm, eb)       # proj


def hnn_layer(x, weight, bias, c=1.0, *, tile_n=None, mxu_dtype=jnp.bfloat16):
    """Fused HNNLayer forward (HypLinear + HypAct, eval mode).

    x:      (N, in_features)  points on the Poincare ball of curvature c
    weight: (out_features, in_features)
    bias:   (out_features,)
    """
    N, d_in = x.shape
    d_out, d_in_w = weight.shape
    assert d_in_w == d_in, "weight shape must be (out_features, in_features)"
    assert bias.shape == (d_out,)

    if tile_n is None:
        # 512-row tiles already sit at the HBM roofline plateau for streaming
        # kernels; also cap so the row grid has >= 4 steps (>= 2 per
        # TensorCore on v7x) whenever N allows.
        quarter = _round_up(max(1, -(-N // 4)), 16)
        tile_n = max(16, min(512, quarter))
    tile_n = min(tile_n, _round_up(N, 16))
    assert tile_n % 16 == 0, "tile_n must be a multiple of 16 (bf16 sublane tiling)"
    grid_n = -(-N // tile_n)   # cdiv; last block may be partial (masked store)

    # Weight transposed (out_features on lanes) and pre-cast for the MXU.
    wt = jnp.swapaxes(weight, 0, 1).astype(mxu_dtype)           # (d_in, d_out)

    # Hyperbolic bias hoisted out of the per-step body (was recomputed per step).
    hb_row = _poincare_bias(bias, c)                            # (1, d_out) f32
    hb_col = jnp.swapaxes(hb_row, 0, 1)                         # (d_out, 1) f32
    hb_ss = jnp.sum(hb_row * hb_row, axis=-1, keepdims=True)    # (1, 1) f32

    kernel = functools.partial(_hnn_layer_kernel, c=float(c))
    out = pl.pallas_call(
        kernel,
        out_shape=jax.ShapeDtypeStruct((N, d_out), x.dtype),
        grid_spec=pltpu.PrefetchScalarGridSpec(
            num_scalar_prefetch=0,
            grid=(grid_n,),
            in_specs=[
                pl.BlockSpec((tile_n, d_in), lambda i: (i, 0)),
                pl.BlockSpec((d_in, d_out), lambda i: (0, 0)),
                pl.BlockSpec((1, d_out), lambda i: (0, 0)),
                pl.BlockSpec((d_out, 1), lambda i: (0, 0)),
                pl.BlockSpec((1, 1), lambda i: (0, 0)),
            ],
            out_specs=pl.BlockSpec((tile_n, d_out), lambda i: (i, 0)),
        ),
        compiler_params=pltpu.CompilerParams(
            dimension_semantics=("parallel",),   # megacore sharding on v7x
            vmem_limit_bytes=32 * 1024 * 1024,   # < 48 MiB v7x guidance
        ),
    )(x, wt, hb_row, hb_col, hb_ss)
    return out


def _hnn_layer_ref(x, weight, bias, c=1.0):
    """Pure-JAX reference following the HGCN PoincareBall code path."""
    c = jnp.float32(c)
    sqrt_c = jnp.sqrt(c)
    maxnorm = (1.0 - EPS_F32) / sqrt_c
    x = x.astype(jnp.float32)
    w = weight.astype(jnp.float32)
    b = bias.astype(jnp.float32)

    def norm(v):
        return jnp.maximum(jnp.linalg.norm(v, axis=-1, keepdims=True), MIN_NORM)

    def proj(p):
        n = norm(p)
        return jnp.where(n > maxnorm, p / n * maxnorm, p)

    def expmap0(u):
        n = norm(u)
        return jnp.tanh(sqrt_c * n) * u / (sqrt_c * n)

    def logmap0(p):
        n = norm(p)
        return _artanh(sqrt_c * n) * p / (sqrt_c * n)

    def mobius_add(p, q):
        x2 = jnp.sum(p * p, axis=-1, keepdims=True)
        y2 = jnp.sum(q * q, axis=-1, keepdims=True)
        xy = jnp.sum(p * q, axis=-1, keepdims=True)
        num = (1 + 2 * c * xy + c * y2) * p + (1 - c * x2) * q
        den = 1 + 2 * c * xy + c * c * x2 * y2
        return num / jnp.maximum(den, MIN_NORM)

    def mobius_matvec(m, p):
        pn = norm(p)
        mp = p @ m.T
        mpn = norm(mp)
        res = jnp.tanh(mpn / pn * _artanh(sqrt_c * pn)) * mp / (mpn * sqrt_c)
        cond = jnp.all(mp == 0, axis=-1, keepdims=True)
        return jnp.where(cond, 0.0, res)

    res = proj(mobius_matvec(w, x))
    hyp_b = proj(expmap0(b.reshape(1, -1)))          # proj_tan0 == identity
    res = proj(mobius_add(res, hyp_b))
    xt = jnp.maximum(logmap0(res), 0.0)              # act == ReLU
    return proj(expmap0(xt))                         # proj_tan0 == identity


if __name__ == "__main__":
    key = jax.random.PRNGKey(0)
    N, d_in, d_out = 100, 64, 128      # small; N deliberately not a tile multiple
    c = 1.0

    k1, k2, k3 = jax.random.split(key, 3)
    raw = jax.random.normal(k1, (N, d_in), dtype=jnp.float32)
    x = raw / jnp.linalg.norm(raw, axis=-1, keepdims=True) * (0.5 / c ** 0.5)
    weight = jax.random.normal(k2, (d_out, d_in), dtype=jnp.float32) * (0.2 / d_in ** 0.5)
    bias = jax.random.normal(k3, (d_out,), dtype=jnp.float32) * 0.05

    # Snap inputs to bf16-representable f32 values so the in-kernel bf16 MXU
    # matmul and the XLA f32 reference matmul agree exactly (products are exact
    # in f32; only the accumulation order differs).
    snap = lambda v: v.astype(jnp.bfloat16).astype(jnp.float32)
    x, weight, bias = snap(x), snap(weight), snap(bias)

    out = jax.block_until_ready(hnn_layer(x, weight, bias, c=c))
    ref = _hnn_layer_ref(x, weight, bias, c=c)

    assert out.shape == (N, d_out) and out.dtype == x.dtype
    max_err = float(jnp.max(jnp.abs(out - ref)))
    assert jnp.allclose(out, ref, atol=1e-4, rtol=1e-4), f"mismatch vs reference: {max_err}"
    print("KERNEL_OK")
</pallas_src>

<mosaic_0001>
module attributes {stable_mosaic.version = 11 : i64} {
  func.func @_hnn_layer_kernel(%arg0: i32, %arg1: memref<32x64xf32, #tpu.memory_space<vmem>>, %arg2: memref<64x128xbf16, #tpu.memory_space<vmem>>, %arg3: memref<1x128xf32, #tpu.memory_space<vmem>>, %arg4: memref<128x1xf32, #tpu.memory_space<vmem>>, %arg5: memref<1x1xf32, #tpu.memory_space<vmem>>, %arg6: memref<32x128xf32, #tpu.memory_space<vmem>>) attributes {dimension_semantics = [#tpu.dimension_semantics<parallel>], iteration_bounds = array<i64: 4>, scalar_prefetch = 0 : i64, scratch_operands = 0 : i64, tpu.core_type = #tpu.core_type<tc>, window_params = [{transform_indices = @transform_0, window_bounds = array<i64: 32, 64>}, {pipeline_mode = #tpu.pipeline_mode<synchronous>, transform_indices = @transform_1, window_bounds = array<i64: 64, 128>}, {pipeline_mode = #tpu.pipeline_mode<synchronous>, transform_indices = @transform_2, window_bounds = array<i64: 1, 128>}, {pipeline_mode = #tpu.pipeline_mode<synchronous>, transform_indices = @transform_3, window_bounds = array<i64: 128, 1>}, {pipeline_mode = #tpu.pipeline_mode<synchronous>, transform_indices = @transform_4, window_bounds = array<i64: 1, 1>}, {transform_indices = @transform_5, window_bounds = array<i64: 32, 128>}]} {
    %c0 = arith.constant 0 : index
    %c0_0 = arith.constant 0 : index
    %0 = vector.load %arg1[%c0, %c0_0] : memref<32x64xf32, #tpu.memory_space<vmem>>, vector<32x64xf32>
    %c0_1 = arith.constant 0 : index
    %c0_2 = arith.constant 0 : index
    %1 = vector.load %arg3[%c0_1, %c0_2] : memref<1x128xf32, #tpu.memory_space<vmem>>, vector<1x128xf32>
    %c0_3 = arith.constant 0 : index
    %c0_4 = arith.constant 0 : index
    %2 = vector.load %arg4[%c0_3, %c0_4] : memref<128x1xf32, #tpu.memory_space<vmem>>, vector<128x1xf32>
    %c0_5 = arith.constant 0 : index
    %c0_6 = arith.constant 0 : index
    %3 = vector.load %arg5[%c0_5, %c0_6] : memref<1x1xf32, #tpu.memory_space<vmem>>, vector<1x1xf32>
    %4 = arith.mulf %0, %0 : vector<32x64xf32>
    %cst = arith.constant dense<0.000000e+00> : vector<32xf32>
    %5 = vector.multi_reduction <add>, %4, %cst [1] : vector<32x64xf32> to vector<32xf32>
    %6 = vector.shape_cast %5 : vector<32xf32> to vector<32x1xf32>
    %cst_7 = arith.constant 1.000000e-30 : f32
    %7 = vector.broadcast %cst_7 : f32 to vector<32x1xf32>
    %8 = arith.maximumf %6, %7 : vector<32x1xf32>
    %9 = math.rsqrt %8 : vector<32x1xf32>
    %10 = arith.mulf %8, %9 : vector<32x1xf32>
    %11 = arith.truncf %0 : vector<32x64xf32> to vector<32x64xbf16>
    %c0_8 = arith.constant 0 : index
    %c0_9 = arith.constant 0 : index
    %12 = vector.load %arg2[%c0_8, %c0_9] : memref<64x128xbf16, #tpu.memory_space<vmem>>, vector<64x128xbf16>
    %cst_10 = arith.constant dense<0.000000e+00> : vector<32x128xf32>
    %13 = tpu.matmul %11, %12, %cst_10 {dimension_numbers = #tpu.dot_dimension_numbers<[1], [0], [0], [1], [0, 0, 1, 1], [], []>} : vector<32x64xbf16>, vector<64x128xbf16>, vector<32x128xf32> -> vector<32x128xf32>
    %14 = arith.mulf %13, %13 : vector<32x128xf32>
    %cst_11 = arith.constant dense<0.000000e+00> : vector<32xf32>
    %15 = vector.multi_reduction <add>, %14, %cst_11 [1] : vector<32x128xf32> to vector<32xf32>
    %16 = vector.shape_cast %15 : vector<32xf32> to vector<32x1xf32>
    %cst_12 = arith.constant 1.000000e-30 : f32
    %17 = vector.broadcast %cst_12 : f32 to vector<32x1xf32>
    %18 = arith.maximumf %16, %17 : vector<32x1xf32>
    %19 = math.rsqrt %18 : vector<32x1xf32>
    %20 = arith.mulf %18, %19 : vector<32x1xf32>
    %21 = arith.mulf %20, %9 : vector<32x1xf32>
    %cst_13 = arith.constant 1.000000e+00 : f32
    %22 = vector.broadcast %cst_13 : f32 to vector<32x1xf32>
    %23 = arith.mulf %22, %10 : vector<32x1xf32>
    %cst_14 = arith.constant -1.000000e+00 : f32
    %cst_15 = arith.constant 1.000000e+00 : f32
    %24 = vector.broadcast %cst_14 : f32 to vector<32x1xf32>
    %25 = arith.maximumf %24, %23 : vector<32x1xf32>
    %26 = vector.broadcast %cst_15 : f32 to vector<32x1xf32>
    %27 = arith.minimumf %26, %25 : vector<32x1xf32>
    %cst_16 = arith.constant 1.000000e+00 : f32
    %28 = vector.broadcast %cst_16 : f32 to vector<32x1xf32>
    %29 = arith.addf %28, %27 : vector<32x1xf32>
    %30 = math.log %29 : vector<32x1xf32>
    %cst_17 = arith.constant 1.000000e+00 : f32
    %31 = vector.broadcast %cst_17 : f32 to vector<32x1xf32>
    %32 = arith.subf %31, %27 : vector<32x1xf32>
    %33 = math.log %32 : vector<32x1xf32>
    %34 = arith.subf %30, %33 : vector<32x1xf32>
    %cst_18 = arith.constant 5.000000e-01 : f32
    %35 = vector.broadcast %cst_18 : f32 to vector<32x1xf32>
    %36 = arith.mulf %35, %34 : vector<32x1xf32>
    %37 = arith.mulf %21, %36 : vector<32x1xf32>
    %38 = math.tanh %37 : vector<32x1xf32>
    %cst_19 = arith.constant 0.000000e+00 : f32
    %39 = vector.broadcast %cst_19 : f32 to vector<32x1xf32>
    %40 = arith.cmpf oeq, %16, %39 : vector<32x1xf32>
    %41 = arith.mulf %38, %19 : vector<32x1xf32>
    %cst_20 = arith.constant 1.000000e+00 : f32
    %42 = vector.broadcast %cst_20 : f32 to vector<32x1xf32>
    %43 = arith.mulf %41, %42 : vector<32x1xf32>
    %cst_21 = arith.constant 0.000000e+00 : f32
    %44 = vector.broadcast %cst_21 : f32 to vector<32x1xf32>
    %45 = arith.select %40, %44, %43 : vector<32x1xi1>, vector<32x1xf32>
    %cst_22 = arith.constant 1.000000e+00 : f32
    %46 = vector.broadcast %cst_22 : f32 to vector<32x1xf32>
    %47 = arith.mulf %38, %46 : vector<32x1xf32>
    %cst_23 = arith.constant 0.000000e+00 : f32
    %48 = vector.broadcast %cst_23 : f32 to vector<32x1xf32>
    %49 = arith.select %40, %48, %47 : vector<32x1xi1>, vector<32x1xf32>
    %cst_24 = arith.constant 1.000000e-15 : f32
    %50 = vector.broadcast %cst_24 : f32 to vector<32x1xf32>
    %51 = arith.maximumf %49, %50 : vector<32x1xf32>
    %cst_25 = arith.constant 0.995999991 : f32
    %52 = vector.broadcast %cst_25 : f32 to vector<32x1xf32>
    %53 = arith.cmpf ogt, %51, %52 : vector<32x1xf32>
    %cst_26 = arith.constant 0.995999991 : f32
    %54 = vector.broadcast %cst_26 : f32 to vector<32x1xf32>
    %55 = arith.divf %54, %51 : vector<32x1xf32>
    %cst_27 = arith.constant 1.000000e+00 : f32
    %56 = vector.broadcast %cst_27 : f32 to vector<32x1xf32>
    %57 = arith.select %53, %55, %56 : vector<32x1xi1>, vector<32x1xf32>
    %58 = arith.mulf %45, %57 : vector<32x1xf32>
    %cst_28 = arith.constant 0.995999991 : f32
    %59 = vector.broadcast %cst_28 : f32 to vector<32x1xf32>
    %60 = arith.select %53, %59, %51 : vector<32x1xi1>, vector<32x1xf32>
    %61 = arith.mulf %60, %60 : vector<32x1xf32>
    %cst_29 = arith.constant dense<0.000000e+00> : vector<32x1xf32>
    %62 = tpu.matmul %13, %2, %cst_29 {dimension_numbers = #tpu.dot_dimension_numbers<[1], [0], [0], [1], [0, 0, 1, 1], [], []>} : vector<32x128xf32>, vector<128x1xf32>, vector<32x1xf32> -> vector<32x1xf32>
    %63 = arith.mulf %58, %62 : vector<32x1xf32>
    %cst_30 = arith.constant 2.000000e+00 : f32
    %64 = vector.broadcast %cst_30 : f32 to vector<32x1xf32>
    %65 = arith.mulf %64, %63 : vector<32x1xf32>
    %cst_31 = arith.constant 1.000000e+00 : f32
    %66 = vector.broadcast %cst_31 : f32 to vector<32x1xf32>
    %67 = arith.addf %66, %65 : vector<32x1xf32>
    %cst_32 = arith.constant 1.000000e+00 : f32
    %68 = vector.broadcast %cst_32 : f32 to vector<32x1xf32>
    %69 = arith.mulf %68, %61 : vector<32x1xf32>
    %70 = vector.broadcast %3 : vector<1x1xf32> to vector<32x1xf32>
    %71 = arith.mulf %69, %70 : vector<32x1xf32>
    %72 = arith.addf %67, %71 : vector<32x1xf32>
    %cst_33 = arith.constant 1.000000e-15 : f32
    %73 = vector.broadcast %cst_33 : f32 to vector<32x1xf32>
    %74 = arith.maximumf %72, %73 : vector<32x1xf32>
    %cst_34 = arith.constant 1.000000e+00 : f32
    %75 = vector.broadcast %cst_34 : f32 to vector<32x1xf32>
    %76 = arith.divf %75, %74 : vector<32x1xf32>
    %cst_35 = arith.constant 1.000000e+00 : f32
    %77 = vector.broadcast %cst_35 : f32 to vector<32x1xf32>
    %78 = arith.addf %77, %65 : vector<32x1xf32>
    %cst_36 = arith.constant 1.000000e+00 : f32
    %79 = vector.broadcast %cst_36 : f32 to vector<1x1xf32>
    %80 = arith.mulf %79, %3 : vector<1x1xf32>
    %81 = vector.broadcast %80 : vector<1x1xf32> to vector<32x1xf32>
    %82 = arith.addf %78, %81 : vector<32x1xf32>
    %83 = arith.mulf %82, %76 : vector<32x1xf32>
    %cst_37 = arith.constant 1.000000e+00 : f32
    %84 = vector.broadcast %cst_37 : f32 to vector<32x1xf32>
    %85 = arith.mulf %84, %61 : vector<32x1xf32>
    %cst_38 = arith.constant 1.000000e+00 : f32
    %86 = vector.broadcast %cst_38 : f32 to vector<32x1xf32>
    %87 = arith.subf %86, %85 : vector<32x1xf32>
    %88 = arith.mulf %87, %76 : vector<32x1xf32>
    %89 = arith.mulf %58, %83 : vector<32x1xf32>
    %90 = vector.broadcast %89 : vector<32x1xf32> to vector<32x128xf32>
    %91 = arith.mulf %13, %90 : vector<32x128xf32>
    %92 = vector.broadcast %1 : vector<1x128xf32> to vector<32x128xf32>
    %93 = vector.broadcast %88 : vector<32x1xf32> to vector<32x128xf32>
    %94 = arith.mulf %92, %93 : vector<32x128xf32>
    %95 = arith.addf %91, %94 : vector<32x128xf32>
    %96 = arith.mulf %83, %83 : vector<32x1xf32>
    %97 = arith.mulf %96, %61 : vector<32x1xf32>
    %98 = arith.mulf %83, %88 : vector<32x1xf32>
    %cst_39 = arith.constant 2.000000e+00 : f32
    %99 = vector.broadcast %cst_39 : f32 to vector<32x1xf32>
    %100 = arith.mulf %99, %98 : vector<32x1xf32>
    %101 = arith.mulf %100, %63 : vector<32x1xf32>
    %102 = arith.addf %97, %101 : vector<32x1xf32>
    %103 = arith.mulf %88, %88 : vector<32x1xf32>
    %104 = vector.broadcast %3 : vector<1x1xf32> to vector<32x1xf32>
    %105 = arith.mulf %103, %104 : vector<32x1xf32>
    %106 = arith.addf %102, %105 : vector<32x1xf32>
    %cst_40 = arith.constant 1.000000e-30 : f32
    %107 = vector.broadcast %cst_40 : f32 to vector<32x1xf32>
    %108 = arith.maximumf %106, %107 : vector<32x1xf32>
    %109 = math.rsqrt %108 : vector<32x1xf32>
    %110 = arith.mulf %108, %109 : vector<32x1xf32>
    %cst_41 = arith.constant 0.995999991 : f32
    %111 = vector.broadcast %cst_41 : f32 to vector<32x1xf32>
    %112 = arith.cmpf ogt, %110, %111 : vector<32x1xf32>
    %cst_42 = arith.constant 0.995999991 : f32
    %113 = vector.broadcast %cst_42 : f32 to vector<32x1xf32>
    %114 = arith.mulf %113, %109 : vector<32x1xf32>
    %cst_43 = arith.constant 1.000000e+00 : f32
    %115 = vector.broadcast %cst_43 : f32 to vector<32x1xf32>
    %116 = arith.select %112, %114, %115 : vector<32x1xi1>, vector<32x1xf32>
    %cst_44 = arith.constant 0.995999991 : f32
    %117 = vector.broadcast %cst_44 : f32 to vector<32x1xf32>
    %118 = arith.select %112, %117, %110 : vector<32x1xi1>, vector<32x1xf32>
    %cst_45 = arith.constant 1.00401604 : f32
    %119 = vector.broadcast %cst_45 : f32 to vector<32x1xf32>
    %120 = arith.select %112, %119, %109 : vector<32x1xi1>, vector<32x1xf32>
    %cst_46 = arith.constant 1.000000e+00 : f32
    %121 = vector.broadcast %cst_46 : f32 to vector<32x1xf32>
    %122 = arith.mulf %121, %118 : vector<32x1xf32>
    %cst_47 = arith.constant -1.000000e+00 : f32
    %cst_48 = arith.constant 1.000000e+00 : f32
    %123 = vector.broadcast %cst_47 : f32 to vector<32x1xf32>
    %124 = arith.maximumf %123, %122 : vector<32x1xf32>
    %125 = vector.broadcast %cst_48 : f32 to vector<32x1xf32>
    %126 = arith.minimumf %125, %124 : vector<32x1xf32>
    %cst_49 = arith.constant 1.000000e+00 : f32
    %127 = vector.broadcast %cst_49 : f32 to vector<32x1xf32>
    %128 = arith.addf %127, %126 : vector<32x1xf32>
    %129 = math.log %128 : vector<32x1xf32>
    %cst_50 = arith.constant 1.000000e+00 : f32
    %130 = vector.broadcast %cst_50 : f32 to vector<32x1xf32>
    %131 = arith.subf %130, %126 : vector<32x1xf32>
    %132 = math.log %131 : vector<32x1xf32>
    %133 = arith.subf %129, %132 : vector<32x1xf32>
    %cst_51 = arith.constant 5.000000e-01 : f32
    %134 = vector.broadcast %cst_51 : f32 to vector<32x1xf32>
    %135 = arith.mulf %134, %133 : vector<32x1xf32>
    %136 = arith.mulf %116, %135 : vector<32x1xf32>
    %cst_52 = arith.constant 1.000000e+00 : f32
    %137 = vector.broadcast %cst_52 : f32 to vector<32x1xf32>
    %138 = arith.mulf %136, %137 : vector<32x1xf32>
    %139 = arith.mulf %138, %120 : vector<32x1xf32>
    %cst_53 = arith.constant 0.000000e+00 : f32
    %140 = vector.broadcast %cst_53 : f32 to vector<32x128xf32>
    %141 = arith.maximumf %95, %140 : vector<32x128xf32>
    %142 = arith.mulf %141, %141 : vector<32x128xf32>
    %cst_54 = arith.constant dense<0.000000e+00> : vector<32xf32>
    %143 = vector.multi_reduction <add>, %142, %cst_54 [1] : vector<32x128xf32> to vector<32xf32>
    %144 = vector.shape_cast %143 : vector<32xf32> to vector<32x1xf32>
    %cst_55 = arith.constant 1.000000e-30 : f32
    %145 = vector.broadcast %cst_55 : f32 to vector<32x1xf32>
    %146 = arith.maximumf %144, %145 : vector<32x1xf32>
    %147 = math.rsqrt %146 : vector<32x1xf32>
    %148 = arith.mulf %146, %147 : vector<32x1xf32>
    %149 = arith.mulf %139, %148 : vector<32x1xf32>
    %cst_56 = arith.constant 1.000000e+00 : f32
    %150 = vector.broadcast %cst_56 : f32 to vector<32x1xf32>
    %151 = arith.mulf %150, %149 : vector<32x1xf32>
    %152 = math.tanh %151 : vector<32x1xf32>
    %cst_57 = arith.constant 1.000000e+00 : f32
    %153 = vector.broadcast %cst_57 : f32 to vector<32x1xf32>
    %154 = arith.mulf %152, %153 : vector<32x1xf32>
    %cst_58 = arith.constant 1.000000e-15 : f32
    %155 = vector.broadcast %cst_58 : f32 to vector<32x1xf32>
    %156 = arith.maximumf %154, %155 : vector<32x1xf32>
    %cst_59 = arith.constant 0.995999991 : f32
    %157 = vector.broadcast %cst_59 : f32 to vector<32x1xf32>
    %158 = arith.cmpf ogt, %156, %157 : vector<32x1xf32>
    %cst_60 = arith.constant 0.995999991 : f32
    %159 = vector.broadcast %cst_60 : f32 to vector<32x1xf32>
    %160 = arith.divf %159, %156 : vector<32x1xf32>
    %cst_61 = arith.constant 1.000000e+00 : f32
    %161 = vector.broadcast %cst_61 : f32 to vector<32x1xf32>
    %162 = arith.select %158, %160, %161 : vector<32x1xi1>, vector<32x1xf32>
    %163 = arith.mulf %152, %147 : vector<32x1xf32>
    %cst_62 = arith.constant 1.000000e+00 : f32
    %164 = vector.broadcast %cst_62 : f32 to vector<32x1xf32>
    %165 = arith.mulf %163, %164 : vector<32x1xf32>
    %166 = arith.mulf %165, %162 : vector<32x1xf32>
    %167 = vector.broadcast %166 : vector<32x1xf32> to vector<32x128xf32>
    %168 = arith.mulf %141, %167 : vector<32x128xf32>
    %c0_63 = arith.constant 0 : index
    %c0_64 = arith.constant 0 : index
    %169 = vector.load %arg6[%c0_63, %c0_64] : memref<32x128xf32, #tpu.memory_space<vmem>>, vector<32x128xf32>
    tpu.vector_store %arg6[%c0_63, %c0_64], %168 {strides = array<i32>} : memref<32x128xf32, #tpu.memory_space<vmem>>, vector<32x128xf32>,
    return
  }
  func.func @transform_0(%arg0: i32) -> (i32, i32) {
    %c0_i32 = arith.constant 0 : i32
    %c0_i32_0 = arith.constant 0 : i32
    return %arg0, %c0_i32 : i32, i32
  }
  func.func @transform_1(%arg0: i32) -> (i32, i32) {
    %c0_i32 = arith.constant 0 : i32
    %c0_i32_0 = arith.constant 0 : i32
    %c0_i32_1 = arith.constant 0 : i32
    return %c0_i32, %c0_i32_0 : i32, i32
  }
  func.func @transform_2(%arg0: i32) -> (i32, i32) {
    %c0_i32 = arith.constant 0 : i32
    %c0_i32_0 = arith.constant 0 : i32
    %c0_i32_1 = arith.constant 0 : i32
    return %c0_i32, %c0_i32_0 : i32, i32
  }
  func.func @transform_3(%arg0: i32) -> (i32, i32) {
    %c0_i32 = arith.constant 0 : i32
    %c0_i32_0 = arith.constant 0 : i32
    %c0_i32_1 = arith.constant 0 : i32
    return %c0_i32, %c0_i32_0 : i32, i32
  }
  func.func @transform_4(%arg0: i32) -> (i32, i32) {
    %c0_i32 = arith.constant 0 : i32
    %c0_i32_0 = arith.constant 0 : i32
    %c0_i32_1 = arith.constant 0 : i32
    return %c0_i32, %c0_i32_0 : i32, i32
  }
  func.func @transform_5(%arg0: i32) -> (i32, i32) {
    %c0_i32 = arith.constant 0 : i32
    %c0_i32_0 = arith.constant 0 : i32
    return %arg0, %c0_i32 : i32, i32
  }
}

</mosaic_0001>

<bundles_post_ra>
// kernel: tpu_custom_call.1
= control target key start
LH: loop header
LB: loop body
LE: loop exit
PB: predicated region body
PF: predicated region fallthrough
CT: control target
= control target key end

     0   :  { %s1770_s0 = inlined_call_operand.vmem [shape: f32[100,64], index: 0, kind: input, shape index: {}]   ;;  %s1771_s1 = inlined_call_operand.vmem [shape: bf16[64,128], index: 1, kind: input, shape index: {}]   ;;  %s1772_s2 = inlined_call_operand.vmem [shape: f32[1,128], index: 2, kind: input, shape index: {}]   ;;  %s1773_s3 = inlined_call_operand.vmem [shape: f32[128,1], index: 3, kind: input, shape index: {}]   ;;  %s1774_s4 = inlined_call_operand.<no memory space> [shape: f32[1,1], index: 4, kind: input, shape index: {}]   ;;  %s1775_s5 = inlined_call_operand.hbm [shape: f32[100,128], index: 5, kind: output, shape index: {}]  }
   0x1   :  { %v10_v0 = vstv %s1774_s4 }
   0x2   :  { %11 = vst [vmem:[#allocation2] sm:$0x1] %v10_v0 }
   0x3   :  { %12 = vsyncpa [#allocation4], 0 }
   0x4   :  { %14 = vsyncpa [#allocation4 + $0x1], 0  ;;  %s1367_s20 = smov 0   ;;  %s1369_s21 = smov 0  }
   0x5   :  { %s1371_s22 = smov 0   ;;  %s1373_s23 = smov 0  }
   0x6 LB: > { %s1388_s4 = sadd.s32 4294967295, %s1328_s23   ;;  %s1008_s24 = sadd.s32 4294967294, %s1328_s23   ;;  %s1328_s23 = sphi %s1373_s23, %s1781_s23   ;;  %s1324_s22 = sphi %s1371_s22, %s1780_s22   ;;  %s1320_s21 = sphi %s1369_s21, %s1779_s21   ;;  %s1316_s20 = sphi %s1367_s20, %s1778_s20  }
   0x7   : > { %s1392_s25 = sadd.s32 1, %s1328_s23   ;;  %s137_s26 = sadd.s32 1, %s1324_s22 }
   0x8   : > { %s134_s27 = ssub.s32 %s1328_s23, %s1392_s25  ;;  %p147_p0 = scmp.ne.s32.totalorder %s1324_s22, %s1320_s21 }
   0x9   : > { %p135_p1 = scmp.eq.s32.totalorder %s134_s27, 0  ;;  %p148_p2 = scmp.eq.s32.totalorder %s1388_s4, 3 }
   0xa   : > { %p153_p3 = scmp.ne.s32.totalorder %s1320_s21, %s1316_s20  ;;  %p154_p4 = scmp.eq.s32.totalorder %s1008_s24, 3 }
   0xb   : > { %s1403_s28 = scalar_select %p135_p1, %s1324_s22, %s137_s26  }
   0xc   : > { %p1405_p5 = por %p148_p2, %p147_p0  ;;  %p1409_p6 = por %p154_p4, %p153_p3 }
   0xd   : > { %p1011_p7 = scmp.ge.s32.totalorder %s1328_s23, 1  ;;  %p201_p8 = scmp.lt.s32.totalorder %s1328_s23, 5 }
   0xf   : > { %p202_p9 = pnand %p1011_p7, %p201_p8 }
  0x10   : > { %s1419_s8 = sshll.u32 (!%p202_p9), %s1388_s4, 2  ;;  %s230_s27 = sand.u32 (!%p202_p9), 1, %s1320_s21  }
  0x11   : > { %205 = sbr.rel (%p202_p9) target bundleno = 963 (0x3c3), region = 40  ;;  %p238_p10 = scmp.lt.s32.totalorder (!%p202_p9), %s1419_s8, 12 }
  0x12   : > { %s1012_s6 = sshll.u32 (!%p202_p9), %s230_s27, 5  ;;  %s1711_s9 = scalar_lea.sflag (!%p202_p9), [#allocation4], %s230_s27 }
  0x13   : > { %s232_s7 = scalar_lea.vmem (!%p202_p9), [#allocation3], %s1012_s6 }
  0x16   : > { %v1160_v1 = vld [vmem:[%s1771_s1 + $0x18] sm:$0xff]   ;;  %v1161_v2 = vld [vmem:[%s1771_s1 + $0x10] sm:$0xff]   ;;  %s239_s11 = scalar_select %p238_p10, %s1419_s8, 12  ;;  %v1162_v3 = vld [vmem:[%s1771_s1 + $0x8] sm:$0xff]   ;;  %vm279_vm0 = vcmask 523264   ;;  %v1330_v45 = vmov 0  }
  0x17   : > { %1067 = vmatprep.subr.bf16.mxu0 %v1160_v1  ;;  %v273_v4 = vld [vmem:[%s1773_s3 + $0x78] sm:$0xff]  ;;  %v272_v5 = vld [vmem:[%s1773_s3 + $0x70] sm:$0xff]  ;;  %v271_v6 = vld [vmem:[%s1773_s3 + $0x68] sm:$0xff]  ;;  %1159 = vset.pattern.permute.xlu1 %v1330_v45  ;;  %s935_s10 = ssub.s32 (%p1405_p5), 13, %s1419_s8 }
  0x18   : > { %1068 = vmatpush3.bf16.msra.mxu0 %v1160_v1  ;;  %s1014_s18 = sshll.u32 %s239_s11, 3  ;;  %1079 = vmatprep.subr.mxu1 %v273_v4  ;;  %v1163_v10 = vld [vmem:[%s1771_s1] sm:$0xff]   ;;  %v269_v23 = vld [vmem:[%s1773_s3 + $0x58] sm:$0xff]  ;;  %v268_v24 = vld [vmem:[%s1773_s3 + $0x50] sm:$0xff]  ;;  %p936_p11 = scmp.lt.s32.totalorder (%p1405_p5), %s935_s10, 4 }
  0x19   : > { %1069 = vmatprep.subr.bf16.mxu0 %v1161_v2  ;;  %s241_s26 = scalar_lea.vmem %s1770_s0, %s1014_s18  ;;  %1080 = vmatpush3.msra.mxu1 %v273_v4  ;;  %v270_v19 = vld [vmem:[%s1773_s3 + $0x60] sm:$0xff]  ;;  %v267_v25 = vld [vmem:[%s1773_s3 + $0x48] sm:$0xff]  ;;  %v265_v27 = vld [vmem:[%s1773_s3 + $0x38] sm:$0xff] }
  0x1a   : > { %v253_v7 = vld [vmem:[%s241_s26] sm:$0xff]  ;;  %v254_v8 = vld [vmem:[%s241_s26 + $0x8] sm:$0xff]  ;;  %v255_v9 = vld [vmem:[%s241_s26 + $0x10] sm:$0xff]  ;;  %1081 = vmatprep.subr.mxu1 %v272_v5  ;;  %1158 = vset.pattern.permute.xlu0 %v1330_v45 }
  0x1b   : > { %v304_v11 = vpack.c.bf16 %v254_v8, %v253_v7  ;;  %v256_v12 = vld [vmem:[%s241_s26 + $0x18] sm:$0xff]  ;;  %v275_v13 = vmul.f32 %v253_v7, %v253_v7  ;;  %v277_v14 = vmul.f32 %v255_v9, %v255_v9  ;;  %v276_v15 = vmul.f32 %v254_v8, %v254_v8  ;;  %1082 = vmatpush3.msra.mxu1 %v272_v5  ;;  %v266_v26 = vld [vmem:[%s1773_s3 + $0x40] sm:$0xff]  ;;  %v264_v28 = vld [vmem:[%s1773_s3 + $0x30] sm:$0xff] }
  0x1c   : > { %1070 = vmatpush3.bf16.msra.mxu0 %v1161_v2  ;;  %v278_v16 = vmul.f32 %v256_v12, %v256_v12  ;;  %1083 = vmatprep.subr.mxu1 %v271_v6  ;;  %v305_v22 = vpack.c.bf16 %v256_v12, %v255_v9  ;;  %v263_v29 = vld [vmem:[%s1773_s3 + $0x28] sm:$0xff]  ;;  %v262_v30 = vld [vmem:[%s1773_s3 + $0x20] sm:$0xff]  ;;  %v261_v31 = vld [vmem:[%s1773_s3 + $0x18] sm:$0xff] }
  0x1d   : > { %1071 = vmatprep.subr.bf16.mxu0 %v1162_v3  ;;  %1075 = vmatprep.mubr.msk.bf16.mxu0 %vm279_vm0, %v304_v11  ;;  %v280_v17 = vsel %vm279_vm0, %v275_v13, 0.0  ;;  %v286_v18 = vsel %vm279_vm0, %v277_v14, 0.0  ;;  %v283_v20 = vsel %vm279_vm0, %v276_v15, 0.0  ;;  %v260_v32 = vld [vmem:[%s1773_s3 + $0x10] sm:$0xff]  ;;  %v259_v33 = vld [vmem:[%s1773_s3 + $0x8] sm:$0xff]  ;;  %v258_v34 = vld [vmem:[%s1773_s3] sm:$0xff] }
  0x1e   : > { %281 = vadd.xlane.f32.xlu0 %v280_v17  ;;  %287 = vadd.xlane.f32.xlu1 %v286_v18  ;;  %v289_v21 = vsel %vm279_vm0, %v278_v16, 0.0 }
  0x1f   : > { %1084 = vmatpush3.msra.mxu1 %v271_v6 }
  0x20   : > { %1072 = vmatpush3.bf16.msra.mxu0 %v1162_v3  ;;  %1085 = vmatprep.subr.mxu1 %v270_v19 }
  0x21   : > { %1073 = vmatprep.subr.bf16.mxu0 %v1163_v10  ;;  %1086 = vmatpush3.msra.mxu1 %v270_v19 }
  0x22   : > { %284 = vadd.xlane.f32.xlu0 %v283_v20  ;;  %290 = vadd.xlane.f32.xlu1 %v289_v21 }
  0x23   : > { %1087 = vmatprep.subr.mxu1 %v269_v23 }
  0x24   : > { %1074 = vmatpush3.bf16.msra.mxu0 %v1163_v10  ;;  %1088 = vmatpush3.msra.mxu1 %v269_v23 }
  0x25   : > { %1089 = vmatprep.subr.mxu1 %v268_v24 }
  0x26   : > { %1090 = vmatpush3.msra.mxu1 %v268_v24 }
  0x27   : > { %1076 = vmatmul.mubr.msk.bf16.vlgmr.msra.gmra.mxu0 %vm279_vm0, %v305_v22  ;;  %1091 = vmatprep.subr.mxu1 %v267_v25 }
  0x28   : > { %1092 = vmatpush3.msra.mxu1 %v267_v25 }
  0x29   : > { %1093 = vmatprep.subr.mxu1 %v266_v26 }
  0x2a   : > { %1094 = vmatpush3.msra.mxu1 %v266_v26 }
  0x2b   : > { %1095 = vmatprep.subr.mxu1 %v265_v27 }
  0x2c   : > { %1096 = vmatpush3.msra.mxu1 %v265_v27 }
  0x2d   : > { %1097 = vmatprep.subr.mxu1 %v264_v28 }
  0x2e   : > { %1098 = vmatpush3.msra.mxu1 %v264_v28 }
  0x2f   : > { %1099 = vmatprep.subr.mxu1 %v263_v29 }
  0x30   : > { %1100 = vmatpush3.msra.mxu1 %v263_v29 }
  0x31   : > { %1101 = vmatprep.subr.mxu1 %v262_v30 }
  0x32   : > { %1102 = vmatpush3.msra.mxu1 %v262_v30 }
  0x33   : > { %1103 = vmatprep.subr.mxu1 %v261_v31 }
  0x34   : > { %1104 = vmatpush3.msra.mxu1 %v261_v31 }
  0x35   : > { %1105 = vmatprep.subr.mxu1 %v260_v32 }
  0x36   : > { %1106 = vmatpush3.msra.mxu1 %v260_v32 }
  0x37   : > { %1107 = vmatprep.subr.mxu1 %v259_v33 }
  0x38   : > { %1108 = vmatpush3.msra.mxu1 %v259_v33 }
  0x39   : > { %1109 = vmatprep.subr.mxu1 %v258_v34 }
  0x3a   : > { %1110 = vmatpush3.msra.mxu1 %v258_v34 }
  0xa7   : > { %v282_v43 = vpop.xlane.xlu0 %281  ;;  %v288_v44 = vpop.xlane.xlu1 %287 }
  0xa8   : > { %v292_v46 = vmax.f32 %v282_v43, 1e-30  ;;  %v294_v48 = vmax.f32 %v288_v44, 1e-30 }
  0xaa   : > { %1164 = vrsqrt.f32 %v292_v46 }
  0xab   : > { %v285_v47 = vpop.xlane.xlu0 %284  ;;  %v291_v50 = vpop.xlane.xlu1 %290  ;;  %1166 = vrsqrt.f32 %v294_v48 }
  0xac   : > { %v293_v49 = vmax.f32 %v285_v47, 1e-30  ;;  %v295_v51 = vmax.f32 %v291_v50, 1e-30 }
  0xae   : > { %1168 = vrsqrt.f32 %v293_v49 }
  0xaf   : > { %1170 = vrsqrt.f32 %v295_v51 }
  0xb7   : > { %v1165_v52 = vpop.eup %1164 }
  0xb8   : > { %v300_v53 = vmul.f32 %v1165_v52, %v292_v46  ;;  %v1509_v54 = vpop.eup %1166 }
  0xb9   : > { %v302_v57 = vmul.f32 %v1509_v54, %v294_v48 }
  0xba   : > { %v1021_v56 = vclamps-f32 %v300_v53, 1.0 }
  0xbb   : > { %v1511_v55 = vpop.eup %1168  ;;  %v1023_v61 = vclamps-f32 %v302_v57, 1.0 }
  0xbc   : > { %v1514_v58 = vpop.eup %1170  ;;  %v301_v59 = vmul.f32 %v1511_v55, %v293_v49  ;;  %v429_v60 = vadd.f32 1.0, %v1021_v56  ;;  %v441_v63 = vsub.f32 1.0, %v1021_v56 }
  0xbd   : > { %v303_v62 = vmul.f32 %v1514_v58, %v295_v51  ;;  %v431_v1 = vadd.f32 1.0, %v1023_v61  ;;  %v443_v5 = vsub.f32 1.0, %v1023_v61 }
  0xbe   : > { %v1022_v0 = vclamps-f32 %v301_v59, 1.0  ;;  %1172 = vlog2.f32 %v429_v60 }
  0xbf   : > { %v1024_v2 = vclamps-f32 %v303_v62, 1.0  ;;  %1174 = vlog2.f32 %v441_v63 }
  0xc0   : > { %v430_v3 = vadd.f32 1.0, %v1022_v0  ;;  %v442_v4 = vsub.f32 1.0, %v1022_v0  ;;  %1176 = vlog2.f32 %v431_v1 }
  0xc1   : > { %v432_v6 = vadd.f32 1.0, %v1024_v2  ;;  %v444_v7 = vsub.f32 1.0, %v1024_v2 }
  0xc2   : > { %1178 = vlog2.f32 %v430_v3 }
  0xc3   : > { %1180 = vlog2.f32 %v442_v4 }
  0xc4   : > { %1182 = vlog2.f32 %v443_v5 }
  0xc5   : > { %1184 = vlog2.f32 %v432_v6 }
  0xc6   : > { %1186 = vlog2.f32 %v444_v7 }
  0xcb   : > { %v1173_v14 = vpop.eup %1172 }
  0xcc   : > { %v1175_v15 = vpop.eup %1174  ;;  %v434_v19 = vmul.f32 0.6931472, %v1173_v14 }
  0xcd   : > { %v1177_v18 = vpop.eup %1176  ;;  %v446_v20 = vmul.f32 0.6931472, %v1175_v15 }
  0xce   : > { %v438_v30 = vmul.f32 0.6931472, %v1177_v18 }
  0xcf   : > { %v1179_v21 = vpop.eup %1178  ;;  %v453_v25 = vsub.f32 %v434_v19, %v446_v20 }
  0xd0   : > { %v1181_v22 = vpop.eup %1180  ;;  %v436_v27 = vmul.f32 0.6931472, %v1179_v21 }
  0xd1   : > { %v1183_v23 = vpop.eup %1182  ;;  %v448_v28 = vmul.f32 0.6931472, %v1181_v22  ;;  %v457_v33 = vmul.f32 0.5, %v453_v25 }
  0xd2   : > { %v1185_v24 = vpop.eup %1184  ;;  %v450_v31 = vmul.f32 0.6931472, %v1183_v23 }
  0xd3   : > { %v1187_v26 = vpop.eup %1186  ;;  %v440_v34 = vmul.f32 0.6931472, %v1185_v24 }
  0xd4   : > { %v455_v43 = vsub.f32 %v438_v30, %v450_v31 }
  0xd6   : > { %v459_v53 = vmul.f32 0.5, %v455_v43 }
  0xe7   : > { %v1489_v35 = vpop.f32.mrf.mxu0 }
  0xe8   : > { %v395_v41 = vmul.f32 %v1489_v35, %v1489_v35 }
  0xe9   : > { %v1491_v36 = vpop.f32.mrf.mxu0 }
  0xea   : > { %1111 = vmatprep.mubr.f32.mxu1 %v1491_v36  ;;  %v393_v37 = vmul.f32 %v1491_v36, %v1491_v36 }
  0xeb   : > { %v1496_v38 = vpop.f32.mrf.mxu0 }
  0xec   : > { %397 = vadd.xlane.f32.xlu0 %v393_v37  ;;  %v396_v42 = vmul.f32 %v1496_v38, %v1496_v38  ;;  %v452_v37 = vmul.f32 0.6931472, %v1187_v26 }
  0xed   : > { %v1498_v39 = vpop.f32.mrf.mxu0 }
  0xee   : > { %1112 = vmatmul.mubr.f32.vlgmr.msra.gmra.mxu1 %v1498_v39  ;;  %v394_v40 = vmul.f32 %v1498_v39, %v1498_v39  ;;  %v456_v50 = vsub.f32 %v440_v34, %v452_v37 }
  0xef   : > { %1114 = vmatprep.mubr.f32.mxu1 %v1489_v35 }
  0xf0   : > { %399 = vadd.xlane.f32.xlu1 %v394_v40  ;;  %401 = vadd.xlane.f32.xlu0 %v395_v41  ;;  %v454_v41 = vsub.f32 %v436_v27, %v448_v28  ;;  %v1553_v28 = vld [vmem:[#allocation2] ss:$0 sm:$0xff] }
  0xf2   : > { %1115 = vmatmul.mubr.f32.gmra.mxu1 %v1496_v38  ;;  %v458_v49 = vmul.f32 0.5, %v454_v41 }
  0xf4   : > { %403 = vadd.xlane.f32.xlu1 %v396_v42 }
 0x175   : > { %v1518_v8 = vpop.xlane.xlu0 %397 }
 0x176   : > { %v405_v9 = vmax.f32 %v1518_v8, 1e-30  ;;  %vm469_vm1 = vcmp.eq.f32.partialorder %v1518_v8, 0.0 }
 0x178   : > { %1188 = vrsqrt.f32 %v405_v9 }
 0x179   : > { %v1521_v10 = vpop.xlane.xlu1 %399  ;;  %v1523_v11 = vpop.xlane.xlu0 %401 }
 0x17a   : > { %v406_v12 = vmax.f32 %v1521_v10, 1e-30  ;;  %v407_v13 = vmax.f32 %v1523_v11, 1e-30  ;;  %vm470_vm2 = vcmp.eq.f32.partialorder %v1521_v10, 0.0  ;;  %vm471_vm3 = vcmp.eq.f32.partialorder %v1523_v11, 0.0 }
 0x17c   : > { %1190 = vrsqrt.f32 %v406_v12 }
 0x17d   : > { %1192 = vrsqrt.f32 %v407_v13  ;;  %v1527_v16 = vpop.xlane.xlu1 %403 }
 0x17e   : > { %v408_v17 = vmax.f32 %v1527_v16, 1e-30  ;;  %vm472_vm4 = vcmp.eq.f32.partialorder %v1527_v16, 0.0 }
 0x180   : > { %1194 = vrsqrt.f32 %v408_v17 }
 0x185   : > { %v1189_v29 = vpop.eup %1188 }
 0x186   : > { %v413_v32 = vmul.f32 %v1189_v29, %v405_v9 }
 0x188   : > { %v417_v40 = vmul.f32 %v1165_v52, %v413_v32  ;;  %v460_v52 = vmul.f32 0.5, %v456_v50 }
 0x189   : > { %v1191_v42 = vpop.eup %1190 }
 0x18a   : > { %v1193_v44 = vpop.eup %1192  ;;  %v461_v45 = vmul.f32 %v457_v33, %v417_v40  ;;  %v414_v46 = vmul.f32 %v1191_v42, %v406_v12 }
 0x18b   : > { %v415_v47 = vmul.f32 %v1193_v44, %v407_v13 }
 0x18c   : > { %1196 = vtanh.f32 %v461_v45  ;;  %v418_v48 = vmul.f32 %v1511_v55, %v414_v46 }
 0x18d   : > { %v1195_v51 = vpop.eup %1194  ;;  %v419_v56 = vmul.f32 %v1509_v54, %v415_v47 }
 0x18e   : > { %v462_v57 = vmul.f32 %v458_v49, %v418_v48  ;;  %v416_v59 = vmul.f32 %v1195_v51, %v408_v17 }
 0x18f   : > { %v463_v60 = vmul.f32 %v459_v53, %v419_v56 }
 0x190   : > { %1198 = vtanh.f32 %v462_v57  ;;  %v420_v61 = vmul.f32 %v1514_v58, %v416_v59 }
 0x191   : > { %1200 = vtanh.f32 %v463_v60 }
 0x192   : > { %v464_v62 = vmul.f32 %v460_v52, %v420_v61 }
 0x194   : > { %1202 = vtanh.f32 %v464_v62 }
 0x199   : > { %v1197_v63 = vpop.eup %1196 }
 0x19a   : > { %v481_v55 = vsel %vm469_vm1, 0.0, %v1197_v63  ;;  %v473_v9 = vmul.f32 %v1197_v63, %v1189_v29 }
 0x19b   : > { %v485_v0 = vmax.f32 %v481_v55, 1e-15 }
 0x19c   : > { %v477_v17 = vsel %vm469_vm1, 0.0, %v473_v9 }
 0x19d   : > { %v1199_v1 = vpop.eup %1198  ;;  %1204 = vrcp.f32 %v485_v0  ;;  %vm489_vm5 = vcmp.gt.f32.partialorder %v485_v0, 0.996 }
 0x19e   : > { %v1201_v54 = vpop.eup %1200  ;;  %v482_v2 = vsel %vm470_vm2, 0.0, %v1199_v1  ;;  %v474_v14 = vmul.f32 %v1199_v1, %v1191_v42  ;;  %v509_v15 = vsel %vm489_vm5, 0.996, %v485_v0 }
 0x19f   : > { %v486_v58 = vmax.f32 %v482_v2, 1e-15  ;;  %v483_v3 = vsel %vm471_vm3, 0.0, %v1201_v54  ;;  %v475_v20 = vmul.f32 %v1201_v54, %v1193_v44  ;;  %v1549_v25 = vmul.f32 %v509_v15, %v509_v15 }
 0x1a0   : > { %v487_v4 = vmax.f32 %v483_v3, 1e-15  ;;  %v478_v26 = vsel %vm470_vm2, 0.0, %v474_v14 }
 0x1a1   : > { %v1203_v5 = vpop.eup %1202  ;;  %1206 = vrcp.f32 %v486_v58  ;;  %vm490_vm6 = vcmp.gt.f32.partialorder %v486_v58, 0.996  ;;  %v479_v34 = vsel %vm471_vm3, 0.0, %v475_v20  ;;  %v620_v43 = vmul.f32 %v1553_v28, %v1549_v25 }
 0x1a2   : > { %1208 = vrcp.f32 %v487_v4  ;;  %v484_v6 = vsel %vm472_vm4, 0.0, %v1203_v5  ;;  %vm491_vm7 = vcmp.gt.f32.partialorder %v487_v4, 0.996  ;;  %v476_v27 = vmul.f32 %v1203_v5, %v1195_v51 }
 0x1a3   : > { %v488_v7 = vmax.f32 %v484_v6, 1e-15  ;;  %v510_v31 = vsel %vm490_vm6, 0.996, %v486_v58  ;;  %v511_v41 = vsel %vm491_vm7, 0.996, %v487_v4 }
 0x1a4   : > { %v480_v46 = vsel %vm472_vm4, 0.0, %v476_v27  ;;  %v1569_v47 = vmul.f32 %v510_v31, %v510_v31  ;;  %v1576_v53 = vmul.f32 %v511_v41, %v511_v41 }
 0x1a5   : > { %1210 = vrcp.f32 %v488_v7  ;;  %vm492_vm8 = vcmp.gt.f32.partialorder %v488_v7, 0.996 }
 0x1a6   : > { %v512_v48 = vsel %vm492_vm8, 0.996, %v488_v7  ;;  %v621_v61 = vmul.f32 %v1553_v28, %v1569_v47  ;;  %v622_v1 = vmul.f32 %v1553_v28, %v1576_v53 }
 0x1a7   : > { %v1587_v62 = vmul.f32 %v512_v48, %v512_v48 }
 0x1a9   : > { %v623_v5 = vmul.f32 %v1553_v28, %v1587_v62 }
 0x1aa   : > { %v1205_v12 = vpop.eup %1204 }
 0x1ab   : > { %v494_v13 = vmul.f32 0.996, %v1205_v12 }
 0x1ad   : > { %v501_v18 = vsel %vm489_vm5, %v494_v13, 1.0  ;;  %v648_v13 = vsub.f32 1.0, %v1549_v25 }
 0x1ae   : > { %v1207_v19 = vpop.eup %1206  ;;  %v1113_v21 = vpop.f32.mrf.mxu1  ;;  %v1547_v22 = vmul.f32 %v501_v18, %v477_v17 }
 0x1af   : > { %v1209_v23 = vpop.eup %1208  ;;  %v496_v24 = vmul.f32 0.996, %v1207_v19  ;;  %v649_v19 = vsub.f32 1.0, %v1569_v47 }
 0x1b0   : > { %v583_v8 = vpop.f32.mrf.mxu1  ;;  %v498_v29 = vmul.f32 0.996, %v1209_v23 }
 0x1b1   : > { %v502_v30 = vsel %vm490_vm6, %v496_v24, 1.0  ;;  %v1556_v32 = vmul.f32 %v583_v8, %v1547_v22 }
 0x1b2   : > { %v1211_v33 = vpop.eup %1210  ;;  %v1560_v37 = vmul.f32 %v502_v30, %v478_v26  ;;  %v1116_v40 = vpop.f32.mrf.mxu1  ;;  %v503_v10 = vsel %vm491_vm7, %v498_v29, 1.0 }
 0x1b3   : > { %v606_v42 = vmul.f32 2.0, %v1556_v32  ;;  %v500_v44 = vmul.f32 0.996, %v1211_v33  ;;  %v1565_v45 = vmul.f32 %v503_v10, %v479_v34  ;;  %v650_v33 = vsub.f32 1.0, %v1576_v53 }
 0x1b4   : > { %v1572_v11 = vmul.f32 %v1113_v21, %v1560_v37  ;;  %v593_v49 = vpop.f32.mrf.mxu1 }
 0x1b5   : > { %v610_v50 = vadd.f32 1.0, %v606_v42  ;;  %v504_v51 = vsel %vm492_vm8, %v500_v44, 1.0  ;;  %v1579_v56 = vmul.f32 %v593_v49, %v1565_v45  ;;  %v651_v49 = vsub.f32 1.0, %v1587_v62 }
 0x1b6   : > { %v607_v57 = vmul.f32 2.0, %v1572_v11  ;;  %v1582_v16 = vmul.f32 %v504_v51, %v480_v46 }
 0x1b7   : > { %v624_v59 = vadd.f32 %v620_v43, %v610_v50  ;;  %v608_v60 = vmul.f32 2.0, %v1579_v56  ;;  %v640_v12 = vadd.f32 %v1553_v28, %v610_v50 }
 0x1b8   : > { %v611_v52 = vadd.f32 1.0, %v607_v57  ;;  %v1590_v63 = vmul.f32 %v1116_v40, %v1582_v16 }
 0x1b9   : > { %v628_v55 = vmax.f32 %v624_v59, 1e-15  ;;  %v612_v0 = vadd.f32 1.0, %v608_v60 }
 0x1ba   : > { %v625_v54 = vadd.f32 %v621_v61, %v611_v52  ;;  %v609_v2 = vmul.f32 2.0, %v1590_v63  ;;  %v641_v18 = vadd.f32 %v1553_v28, %v611_v52 }
 0x1bb   : > { %1212 = vrcp.f32 %v628_v55  ;;  %v626_v58 = vadd.f32 %v622_v1, %v612_v0  ;;  %v642_v20 = vadd.f32 %v1553_v28, %v612_v0 }
 0x1bc   : > { %v629_v3 = vmax.f32 %v625_v54, 1e-15  ;;  %v613_v4 = vadd.f32 1.0, %v609_v2 }
 0x1bd   : > { %v630_v6 = vmax.f32 %v626_v58, 1e-15 }
 0x1be   : > { %1214 = vrcp.f32 %v629_v3  ;;  %v627_v7 = vadd.f32 %v623_v5, %v613_v4  ;;  %v643_v31 = vadd.f32 %v1553_v28, %v613_v4 }
 0x1bf   : > { %1216 = vrcp.f32 %v630_v6 }
 0x1c0   : > { %v631_v9 = vmax.f32 %v627_v7, 1e-15 }
 0x1c2   : > { %1218 = vrcp.f32 %v631_v9 }
 0x1c8   : > { %v1213_v14 = vpop.eup %1212 }
 0x1c9   : > { %v644_v15 = vmul.f32 %v1213_v14, %v640_v12  ;;  %v652_v17 = vmul.f32 %v1213_v14, %v648_v13 }
 0x1cb   : > { %v1215_v21 = vpop.eup %1214  ;;  %v718_v23 = vmul.f32 %v644_v15, %v644_v15  ;;  %v726_v24 = vmul.f32 %v652_v17, %v644_v15  ;;  %v742_v26 = vmul.f32 %v652_v17, %v652_v17  ;;  %692 = vperm.xlu1 %1159, %v652_v17   ;;  %v656_v27 = vmul.f32 %v644_v15, %v1547_v22 }
 0x1cc   : > { %v1217_v8 = vpop.eup %1216  ;;  %v645_v29 = vmul.f32 %v1215_v21, %v641_v18  ;;  %v653_v30 = vmul.f32 %v1215_v21, %v649_v19 }
 0x1cd   : > { %v722_v34 = vmul.f32 %v718_v23, %v1549_v25  ;;  %v730_v40 = vmul.f32 2.0, %v726_v24  ;;  %v746_v10 = vmul.f32 %v1553_v28, %v742_v26  ;;  %v646_v41 = vmul.f32 %v1217_v8, %v642_v20  ;;  %662 = vperm.xlu0 %1158, %v656_v27  }
 0x1ce   : > { %v719_v42 = vmul.f32 %v645_v29, %v645_v29  ;;  %v727_v43 = vmul.f32 %v653_v30, %v645_v29  ;;  %v743_v44 = vmul.f32 %v653_v30, %v653_v30  ;;  %v654_v46 = vmul.f32 %v1217_v8, %v650_v33 }
 0x1cf   : > { %v1219_v48 = vpop.eup %1218  ;;  %v734_v22 = vmul.f32 %v730_v40, %v1556_v32  ;;  %v720_v50 = vmul.f32 %v646_v41, %v646_v41  ;;  %697 = vperm.xlu1 %1159, %v653_v30   ;;  %v657_v15 = vmul.f32 %v645_v29, %v1560_v37 }
 0x1d0   : > { %v723_v51 = vmul.f32 %v719_v42, %v1569_v47  ;;  %v731_v57 = vmul.f32 2.0, %v727_v43  ;;  %v747_v25 = vmul.f32 %v1553_v28, %v743_v44  ;;  %v647_v59 = vmul.f32 %v1219_v48, %v643_v31 }
 0x1d1   : > { %v738_v60 = vadd.f32 %v734_v22, %v722_v34  ;;  %v655_v52 = vmul.f32 %v1219_v48, %v651_v49  ;;  %v724_v61 = vmul.f32 %v720_v50, %v1576_v53  ;;  %v728_v55 = vmul.f32 %v654_v46, %v646_v41 }
 0x1d2   : > { %v735_v0 = vmul.f32 %v731_v57, %v1572_v11  ;;  %v721_v1 = vmul.f32 %v647_v59, %v647_v59  ;;  %v744_v54 = vmul.f32 %v654_v46, %v654_v46  ;;  %v659_v32 = vmul.f32 %v647_v59, %v1582_v16 }
 0x1d3   : > { %v1614_v2 = vadd.f32 %v746_v10, %v738_v60  ;;  %v729_v58 = vmul.f32 %v655_v52, %v647_v59  ;;  %v745_v3 = vmul.f32 %v655_v52, %v655_v52  ;;  %v732_v47 = vmul.f32 2.0, %v728_v55 }
 0x1d4   : > { %v739_v4 = vadd.f32 %v735_v0, %v723_v51  ;;  %v725_v5 = vmul.f32 %v721_v1, %v1587_v62  ;;  %v748_v6 = vmul.f32 %v1553_v28, %v744_v54  ;;  %677 = vperm.xlu1 %1159, %v659_v32   ;;  %v658_v62 = vmul.f32 %v646_v41, %v1565_v45 }
 0x1d5   : > { %v733_v7 = vmul.f32 2.0, %v729_v58  ;;  %v749_v53 = vmul.f32 %v1553_v28, %v745_v3  ;;  %v736_v11 = vmul.f32 %v732_v47, %v1579_v56  ;;  %v1026_v28 = vld [vmem:[%s1772_s2] ss:$0 sm:$0xff]  ;;  %v754_v48 = vmax.f32 %v1614_v2, 1e-30 }
 0x1d6   : > { %v751_v9 = vadd.f32 %v747_v25, %v739_v4 }
 0x1d7   : > { %v737_v12 = vmul.f32 %v733_v7, %v1590_v63  ;;  %v740_v16 = vadd.f32 %v736_v11, %v724_v61  ;;  %1220 = vrsqrt.f32 %v754_v48 }
 0x1d8   : > { %702 = vperm.xlu1 %1159, %v654_v46   ;;  %v755_v22 = vmax.f32 %v751_v9, 1e-30 }
 0x1d9   : > { %v741_v13 = vadd.f32 %v737_v12, %v725_v5  ;;  %v752_v14 = vadd.f32 %v748_v6, %v740_v16 }
 0x1da   : > { %1222 = vrsqrt.f32 %v755_v22 }
 0x1db   : > { %v1622_v17 = vadd.f32 %v749_v53, %v741_v13  ;;  %v756_v49 = vmax.f32 %v752_v14, 1e-30 }
 0x1dc   : > { %667 = vperm.xlu1 %1159, %v657_v15  }
 0x1dd   : > { %1224 = vrsqrt.f32 %v756_v49  ;;  %v757_v51 = vmax.f32 %v1622_v17, 1e-30 }
 0x1df   : > { %1226 = vrsqrt.f32 %v757_v51 }
 0x1e0   : > { %672 = vperm.xlu1 %1159, %v658_v62  }
 0x1e4   : > { %707 = vperm.xlu1 %1159, %v655_v52  }
 0x246   : > { %v693_v56 = vpop.permute.xlu1 %692 }
 0x247   : > { %v710_v63 = vmul.f32 %v1026_v28, %v693_v56 }
 0x248   : > { %v663_v18 = vpop.permute.xlu0 %662 }
 0x249   : > { %v680_v19 = vmul.f32 %v663_v18, %v1491_v36 }
 0x24a   : > { %v698_v20 = vpop.permute.xlu1 %697 }
 0x24b   : > { %v714_v21 = vadd.f32 %v710_v63, %v680_v19  ;;  %v711_v27 = vmul.f32 %v1026_v28, %v698_v20 }
 0x24d   : > { %v1629_v23 = vmax.f32 %v714_v21, 0.0 }
 0x24f   : > { %v678_v37 = vpop.permute.xlu1 %677  ;;  %v838_v24 = vmul.f32 %v1629_v23, %v1629_v23 }
 0x250   : > { %v683_v41 = vmul.f32 %v1496_v38, %v678_v37  ;;  %v1221_v38 = vpop.eup %1220 }
 0x251   : > { %842 = vadd.xlane.f32.xlu1 %v838_v24  ;;  %v762_v50 = vmul.f32 %v1221_v38, %v754_v48  ;;  %v1651_v59 = vpop.eup %1222 }
 0x252   : > { %v1653_v52 = vpop.eup %1224  ;;  %v1656_v61 = vmul.f32 %v1651_v59, %v755_v22 }
 0x253   : > { %v703_v45 = vpop.permute.xlu1 %702  ;;  %vm766_vm9 = vcmp.gt.f32.partialorder %v762_v50, 0.996  ;;  %v1659_v0 = vmul.f32 %v1653_v52, %v756_v49  ;;  %v1662_v1 = vpop.eup %1226 }
 0x254   : > { %v712_v31 = vmul.f32 %v1026_v28, %v703_v45  ;;  %v778_v57 = vsel %vm766_vm9, 0.996, %v762_v50  ;;  %vm767_vm10 = vcmp.gt.f32.partialorder %v1656_v61, 0.996  ;;  %v1669_v32 = vmul.f32 %v1662_v1, %v757_v51 }
 0x255   : > { %v1027_v25 = vclamps-f32 %v778_v57, 1.0  ;;  %v779_v54 = vsel %vm767_vm10, 0.996, %v1656_v61  ;;  %vm768_vm11 = vcmp.gt.f32.partialorder %v1659_v0, 0.996 }
 0x256   : > { %v1028_v2 = vclamps-f32 %v779_v54, 1.0  ;;  %v780_v58 = vsel %vm768_vm11, 0.996, %v1659_v0  ;;  %vm769_vm12 = vcmp.gt.f32.partialorder %v1669_v32, 0.996 }
 0x257   : > { %v668_v26 = vpop.permute.xlu1 %667  ;;  %v794_v60 = vadd.f32 1.0, %v1027_v25  ;;  %v806_v55 = vsub.f32 1.0, %v1027_v25  ;;  %v1029_v3 = vclamps-f32 %v780_v58, 1.0  ;;  %v781_v5 = vsel %vm769_vm12, 0.996, %v1669_v32 }
 0x258   : > { %v681_v8 = vmul.f32 %v668_v26, %v1498_v39  ;;  %v795_v47 = vadd.f32 1.0, %v1028_v2  ;;  %v807_v4 = vsub.f32 1.0, %v1028_v2  ;;  %v1030_v11 = vclamps-f32 %v781_v5, 1.0 }
 0x259   : > { %1228 = vlog2.f32 %v794_v60  ;;  %v796_v53 = vadd.f32 1.0, %v1029_v3  ;;  %v808_v12 = vsub.f32 1.0, %v1029_v3  ;;  %v782_v37 = vsel %vm766_vm9, 1.004016, %v1221_v38 }
 0x25a   : > { %v715_v29 = vadd.f32 %v711_v27, %v681_v8  ;;  %1230 = vlog2.f32 %v806_v55  ;;  %v797_v15 = vadd.f32 1.0, %v1030_v11  ;;  %v809_v17 = vsub.f32 1.0, %v1030_v11 }
 0x25b   : > { %v673_v30 = vpop.permute.xlu1 %672  ;;  %1232 = vlog2.f32 %v795_v47  ;;  %v772_v25 = vmul.f32 0.996, %v1653_v52  ;;  %v783_v58 = vsel %vm767_vm10, 1.004016, %v1651_v59  ;;  %v773_v47 = vmul.f32 0.996, %v1662_v1 }
 0x25c   : > { %v1634_v33 = vmax.f32 %v715_v29, 0.0  ;;  %v682_v36 = vmul.f32 %v1489_v35, %v673_v30  ;;  %1234 = vlog2.f32 %v807_v4 }
 0x25d   : > { %1236 = vlog2.f32 %v796_v53  ;;  %v776_v3 = vsel %vm768_vm11, %v772_v25, 1.0  ;;  %v777_v61 = vsel %vm769_vm12, %v773_v47, 1.0 }
 0x25e   : > { %v716_v34 = vadd.f32 %v712_v31, %v682_v36  ;;  %v839_v40 = vmul.f32 %v1634_v33, %v1634_v33 }
 0x25f   : > { %v708_v10 = vpop.permute.xlu1 %707 }
 0x260   : > { %v1640_v42 = vmax.f32 %v716_v34, 0.0  ;;  %v713_v43 = vmul.f32 %v1026_v28, %v708_v10  ;;  %844 = vadd.xlane.f32.xlu0 %v839_v40  ;;  %v770_v28 = vmul.f32 0.996, %v1221_v38 }
 0x262   : > { %v717_v44 = vadd.f32 %v713_v43, %v683_v41  ;;  %v840_v39 = vmul.f32 %v1640_v42, %v1640_v42  ;;  %v774_v63 = vsel %vm766_vm9, %v770_v28, 1.0 }
 0x264   : > { %v1644_v46 = vmax.f32 %v717_v44, 0.0  ;;  %846 = vadd.xlane.f32.xlu0 %v840_v39 }
 0x266   : > { %v841_v35 = vmul.f32 %v1644_v46, %v1644_v46  ;;  %v1229_v6 = vpop.eup %1228 }
 0x267   : > { %v1231_v7 = vpop.eup %1230  ;;  %v799_v16 = vmul.f32 0.6931472, %v1229_v6 }
 0x268   : > { %848 = vadd.xlane.f32.xlu1 %v841_v35  ;;  %v811_v13 = vmul.f32 0.6931472, %v1231_v7  ;;  %v1233_v18 = vpop.eup %1232  ;;  %v771_v35 = vmul.f32 0.996, %v1651_v59 }
 0x269   : > { %v1235_v19 = vpop.eup %1234  ;;  %v801_v26 = vmul.f32 0.6931472, %v1233_v18 }
 0x26a   : > { %v818_v62 = vsub.f32 %v799_v16, %v811_v13  ;;  %v1237_v21 = vpop.eup %1236  ;;  %v813_v27 = vmul.f32 0.6931472, %v1235_v19  ;;  %v775_v57 = vsel %vm767_vm10, %v771_v35, 1.0 }
 0x26b   : > { %v803_v41 = vmul.f32 0.6931472, %v1237_v21 }
 0x26c   : > { %v822_v56 = vmul.f32 0.5, %v818_v62  ;;  %v819_v10 = vsub.f32 %v801_v26, %v813_v27  ;;  %v785_v62 = vsel %vm769_vm12, 1.004016, %v1662_v1 }
 0x26e   : > { %v826_v20 = vmul.f32 %v822_v56, %v774_v63  ;;  %v823_v38 = vmul.f32 0.5, %v819_v10 }
 0x270   : > { %v830_v30 = vmul.f32 %v826_v20, %v782_v37  ;;  %v827_v60 = vmul.f32 %v823_v38, %v775_v57 }
 0x272   : > { %v831_v4 = vmul.f32 %v827_v60, %v783_v58 }
 0x2da   : > { %v843_v9 = vpop.xlane.xlu1 %842 }
 0x2db   : > { %v850_v14 = vmax.f32 %v843_v9, 1e-30 }
 0x2dd   : > { %1238 = vrsqrt.f32 %v850_v14 }
 0x2de   : > { %1240 = vlog2.f32 %v808_v12  ;;  %v784_v12 = vsel %vm768_vm11, 1.004016, %v1653_v52 }
 0x2df   : > { %1242 = vlog2.f32 %v797_v15 }
 0x2e0   : > { %1244 = vlog2.f32 %v809_v17 }
 0x2e9   : > { %v845_v24 = vpop.xlane.xlu0 %844 }
 0x2ea   : > { %v1680_v45 = vpop.eup %1238  ;;  %v851_v8 = vmax.f32 %v845_v24, 1e-30 }
 0x2eb   : > { %v1241_v29 = vpop.eup %1240  ;;  %v858_v31 = vmul.f32 %v1680_v45, %v850_v14 }
 0x2ec   : > { %1246 = vrsqrt.f32 %v851_v8  ;;  %v1243_v40 = vpop.eup %1242  ;;  %v815_v43 = vmul.f32 0.6931472, %v1241_v29 }
 0x2ed   : > { %v862_v36 = vmul.f32 %v858_v31, %v830_v30  ;;  %v847_v34 = vpop.xlane.xlu0 %846  ;;  %v1245_v39 = vpop.eup %1244  ;;  %v805_v48 = vmul.f32 0.6931472, %v1243_v40 }
 0x2ee   : > { %v852_v44 = vmax.f32 %v847_v34, 1e-30  ;;  %v820_v49 = vsub.f32 %v803_v41, %v815_v43  ;;  %v817_v50 = vmul.f32 0.6931472, %v1245_v39 }
 0x2ef   : > { %1248 = vtanh.f32 %v862_v36 }
 0x2f0   : > { %1250 = vrsqrt.f32 %v852_v44  ;;  %v824_v55 = vmul.f32 0.5, %v820_v49  ;;  %v821_v54 = vsub.f32 %v805_v48, %v817_v50 }
 0x2f1   : > { %v849_v22 = vpop.xlane.xlu1 %848 }
 0x2f2   : > { %v853_v51 = vmax.f32 %v849_v22, 1e-30  ;;  %v828_v6 = vmul.f32 %v824_v55, %v776_v3  ;;  %v825_v7 = vmul.f32 0.5, %v821_v54 }
 0x2f4   : > { %1252 = vrsqrt.f32 %v853_v51  ;;  %v832_v16 = vmul.f32 %v828_v6, %v784_v12  ;;  %v829_v14 = vmul.f32 %v825_v7, %v777_v61 }
 0x2f6   : > { %v833_v28 = vmul.f32 %v829_v14, %v785_v62 }
 0x2f9   : > { %v1247_v2 = vpop.eup %1246 }
 0x2fa   : > { %v859_v5 = vmul.f32 %v1247_v2, %v851_v8 }
 0x2fc   : > { %v1249_v53 = vpop.eup %1248  ;;  %v863_v11 = vmul.f32 %v859_v5, %v831_v4 }
 0x2fd   : > { %v1251_v9 = vpop.eup %1250  ;;  %v870_v59 = vmax.f32 %v1249_v53, 1e-15  ;;  %v890_v20 = vmul.f32 %v1249_v53, %v1680_v45 }
 0x2fe   : > { %1254 = vtanh.f32 %v863_v11  ;;  %v860_v13 = vmul.f32 %v1251_v9, %v852_v44 }
 0x2ff   : > { %1256 = vrcp.f32 %v870_v59  ;;  %vm874_vm13 = vcmp.gt.f32.partialorder %v870_v59, 0.996 }
 0x300   : > { %v864_v15 = vmul.f32 %v860_v13, %v832_v16 }
 0x301   : > { %v1253_v17 = vpop.eup %1252 }
 0x302   : > { %1258 = vtanh.f32 %v864_v15  ;;  %v861_v0 = vmul.f32 %v1253_v17, %v853_v51 }
 0x304   : > { %v865_v52 = vmul.f32 %v861_v0, %v833_v28 }
 0x306   : > { %1260 = vtanh.f32 %v865_v52 }
 0x30b   : > { %v1255_v56 = vpop.eup %1254 }
 0x30c   : > { %v1257_v18 = vpop.eup %1256  ;;  %v871_v63 = vmax.f32 %v1255_v56, 1e-15  ;;  %v891_v29 = vmul.f32 %v1255_v56, %v1247_v2 }
 0x30d   : > { %v879_v19 = vmul.f32 0.996, %v1257_v18 }
 0x30e   : > { %1262 = vrcp.f32 %v871_v63  ;;  %vm875_vm14 = vcmp.gt.f32.partialorder %v871_v63, 0.996 }
 0x30f   : > { %v1259_v21 = vpop.eup %1258  ;;  %v886_v37 = vsel %vm874_vm13, %v879_v19, 1.0 }
 0x310   : > { %v894_v24 = vmul.f32 %v890_v20, %v886_v37  ;;  %v872_v32 = vmax.f32 %v1259_v21, 1e-15  ;;  %v892_v34 = vmul.f32 %v1259_v21, %v1251_v9 }
 0x312   : > { %900 = vperm.xlu0 %1158, %v894_v24   ;;  %1264 = vrcp.f32 %v872_v32  ;;  %vm876_vm15 = vcmp.gt.f32.partialorder %v872_v32, 0.996 }
 0x313   : > { %v1261_v1 = vpop.eup %1260 }
 0x314   : > { %v873_v26 = vmax.f32 %v1261_v1, 1e-15  ;;  %v893_v44 = vmul.f32 %v1261_v1, %v1253_v17 }
 0x316   : > { %1266 = vrcp.f32 %v873_v26  ;;  %vm877_vm0 = vcmp.gt.f32.partialorder %v873_v26, 0.996 }
 0x31b   : > { %v1263_v27 = vpop.eup %1262 }
 0x31c   : > { %v881_v8 = vmul.f32 0.996, %v1263_v27 }
 0x31e   : > { %v887_v30 = vsel %vm875_vm14, %v881_v8, 1.0 }
 0x31f   : > { %v1265_v31 = vpop.eup %1264  ;;  %v895_v36 = vmul.f32 %v891_v29, %v887_v30 }
 0x320   : > { %v883_v45 = vmul.f32 0.996, %v1265_v31 }
 0x321   : > { %905 = vperm.xlu1 %1159, %v895_v36  }
 0x322   : > { %v888_v40 = vsel %vm876_vm15, %v883_v45, 1.0 }
 0x323   : > { %v1267_v10 = vpop.eup %1266  ;;  %v896_v41 = vmul.f32 %v892_v34, %v888_v40 }
 0x324   : > { %v885_v43 = vmul.f32 0.996, %v1267_v10 }
 0x325   : > { %910 = vperm.xlu1 %1159, %v896_v41  }
 0x326   : > { %v889_v39 = vsel %vm877_vm0, %v885_v43, 1.0 }
 0x327   : > { %v897_v35 = vmul.f32 %v893_v44, %v889_v39 }
 0x329   : > { %915 = vperm.xlu0 %1158, %v897_v35  }
 0x38d   : > { %v901_v48 = vpop.permute.xlu0 %900 }
 0x38e   : > { %v918_v22 = vmul.f32 %v901_v48, %v1629_v23 }
 0x390   : > { %922 = vst [vmem:[%s232_s7] sm:$0xff] %v918_v22 }
 0x39c   : > { %v906_v38 = vpop.permute.xlu1 %905 }
 0x39d   : > { %v919_v49 = vmul.f32 %v906_v38, %v1634_v33 }
 0x39f   : > { %923 = vst [vmem:[%s232_s7 + $0x8] sm:$0xff] %v919_v49 }
 0x3a0   : > { %v911_v50 = vpop.permute.xlu1 %910 }
 0x3a1   : > { %v920_v51 = vmul.f32 %v911_v50, %v1640_v42 }
 0x3a3   : > { %924 = vst [vmem:[%s232_s7 + $0x10] sm:$0xff] %v920_v51  ;;  %933 = sbr.rel (!%p1405_p5) target bundleno = 963 (0x3c3), region = 44 }
 0x3a4   : > { %v916_v57 = vpop.permute.xlu0 %915 }
 0x3a5   : > { %v921_v25 = vmul.f32 %v916_v57, %v1644_v46 }
 0x3a7   : > { %925 = vst [vmem:[%s232_s7 + $0x18] sm:$0xff] %v921_v25 }
 0x3a8   : > { %s1783_s10 = smov (!%p936_p11, %s935_s10), 4 }
 0x3a9   : > { %s1716_s11 = sshll.u32 %s1783_s10, 7 }
 0x3aa   : > { %s940_s12 = ssub.s32 512, %s1716_s11 }
 0x3ab   : > { %941 = vsyncadd %s1711_s9, %s940_s12  ;;  %p1034_p12 = scmp.ne.s32.totalorder %s1716_s11, 0  ;;  %s1040_s13 = sshll.u32 %s1388_s4, 9 }
 0x3ac   : > { %s1725_s29 = scalar_lea.hbm %s1775_s5, %s1040_s13  ;;  %s946_s16 = sshll.u32 %s232_s7, 4  ;;  %s1727_s16 = int_to_ptr.vmem [resolvable:$true] %s946_s16 }
 0x3ad   : > { %s1268_s8 = scalar_lea.vmem %s1727_s16, %s1716_s11  ;;  %s1331_s17 = smov [#allocation3]  }
 0x3ae   : > { %p1269_p13 = scmp.ne.s32.totalorder %s1727_s16, %s1268_s8  ;;  %s1272_s18 = sshll.u32 %s1331_s17, 4  ;;  %s1273_s18 = int_to_ptr.vmem [resolvable:$false] %s1272_s18 }
 0x3af   : > { %s1274_s4 = scalar_lea.vmem %s1273_s18, 1024  ;;  %p1275_p2 = scmp.lt.s32.totalorder %s1727_s16, %s1273_s18 }
 0x3b0   : > { %p1270_p0 = pnand %p1269_p13, %p1034_p12  ;;  %p1276_p3 = scmp.lt.s32.totalorder %s1274_s4, %s1268_s8 }
 0x3b2   : > { %p1271_p1 = pneg %p1270_p0  ;;  %p1277_p4 = por %p1276_p3, %p1275_p2 }
 0x3b4   : > { %p1278_p5 = pnand %p1277_p4, %p1271_p1 }
 0x3b6   : > { %1281 = shalt.err (!%p1278_p5)
}
 0x3b7   : > { %s1282_s19 = scalar_lea.hbm %s1725_s29, %s1716_s11  ;;  %s1286_s27 = scalar_lea.hbm %s1775_s5, 1664 }
 0x3b8   : > { %p1283_p7 = scmp.ne.s32.totalorder %s1725_s29, %s1282_s19  ;;  %p1287_p10 = scmp.lt.s32.totalorder %s1725_s29, %s1775_s5 }
 0x3b9   : > { %p1288_p11 = scmp.lt.s32.totalorder %s1286_s27, %s1282_s19 }
 0x3ba   : > { %p1284_p8 = pnand %p1283_p7, %p1034_p12 }
 0x3bb   : > { %p1289_p13 = por %p1288_p11, %p1287_p10 }
 0x3bc   : > { %p1285_p9 = pneg %p1284_p8 }
 0x3be   : > { %p1290_p0 = pnand %p1289_p13, %p1285_p9 }
 0x3c0   : > { %1293 = shalt.err (!%p1290_p0)
}
 0x3c1   : > { %s1332_s10 = smov 128   ;;  %s1333_s12 = smov 8  }
 0x3c2   : > { %952 = dma.vmem_to_hbm [thread:$0]  (%p1034_p12), %s1727_s16, %s1716_s11, %s1725_s29, %s1711_s9, %s1332_s10, %s1332_s10, %s1333_s12  }
 0x3c3 PF: > { %p1122_p1 = scmp.ge.s32.totalorder %s1328_s23, 2  ;;  %s961_s13 = sand.u32 1, %s1316_s20  }
 0x3c4   : > { %s962_s14 = scalar_lea.sflag [#allocation4], %s961_s13 }
 0x3c5   : > { %p1119_p2 = pnand %p1122_p1, %p1409_p6 }
 0x3c7   : > { %p1120_p3 = pneg %p1119_p2 }
 0x3c9   : > { %1311 = dma.done.wait (%p1120_p3), %s962_s14, 512  }
 0x3ca   : > { %1313 = vsyncadd (%p1120_p3), %s962_s14, 4294966784  ;;  %p17_p4 = scmp.ge.s32.totalorder %s1392_s25, 6   ;;  %s1778_s20 = smov %s1320_s21 }
 0x3cb   : > { %s1779_s21 = smov %s1324_s22  ;;  %s1780_s22 = smov %s1403_s28 }
 0x3cc   : > { %s1781_s23 = smov %s1392_s25  ;;  %19 = sbr.rel (!%p17_p4) target bundleno = 6 (0x6), region = 75 }
 0x3d1   :  { %967 = vsyncpa [#allocation4], 1 }
 0x3d2   :  { %969 = vsyncpa [#allocation4 + $0x1], 1 }

</bundles_post_ra>
